<compile_context>
chip_gen: v5e
topology: v5e:2x2
jax: 0.10.0
libtpu: 0.0.40
codegen_flags: <defaults>
</compile_context>

<pallas_src>
import functools

import jax
import jax.numpy as jnp
from jax.experimental import pallas as pl
from jax.experimental.pallas import tpu as pltpu


def _apply_activation(z, activation):
    if activation == "cos":
        return jnp.cos(z)
    if activation == "exp":
        return jnp.exp(-z * z / 2.0)
    if activation == "relu":
        return jnp.maximum(z, 0.0)
    if activation == "tanh":
        return jnp.tanh(z)
    if activation == "sigmoid":
        return jax.nn.sigmoid(z)
    raise ValueError(f"unknown activation: {activation}")


def _mlp_kernel(x_ref, w1_ref, b1_ref, w2_ref, b2_ref, o_ref, *, activation):
    # fc1 on the MXU: [T, D] @ [D, H] + [1, H], f32 accumulation.  At these
    # K/N the MXU is far from full; it is filler under the HBM stream of x,
    # so no padding of K/N is attempted.
    z = jnp.dot(x_ref[...], w1_ref[...], preferred_element_type=jnp.float32)
    a = _apply_activation(z + b1_ref[...], activation)

    # fc2 (output width 1): VPU broadcast-multiply + lane reduction instead of
    # a one-useful-lane MXU matmul.  b2 comes from SMEM as a scalar.
    y = jnp.sum(a * w2_ref[...], axis=-1) + b2_ref[0, 0]        # [T]

    # Lane-dense store: the batch tile lands on the lane axis of the output row.
    o_ref[...] = y[None, :].astype(o_ref.dtype)


def _round_up(n, m):
    return ((n + m - 1) // m) * m


def net_forward(x, w1, b1, w2, b2, *, activation="tanh", block_b=None):
    """Pallas forward pass of Net.

    Args:
      x:  [B, D] float32
      w1: [D, H] float32   (PyTorch fc1.weight is [H, D]; this is its transpose)
      b1: [H]    float32
      w2: [H, 1] float32   (PyTorch fc2.weight is [1, H]; this is its transpose)
      b2: [1]    float32
      block_b: batch tile (rows per grid step).  Rounded up to a multiple of 128
        so the lane-dense output block stays aligned.  For realistic batches a
        large tile (2048-8192) amortizes per-grid-step overhead; even at 8192
        the f32 x tile is only 0.5 MiB, well within v7x's 64 MiB VMEM.
    Returns:
      [B, 1] float32
    """
    B, D = x.shape
    H = w1.shape[1]

    if block_b is None:
        block_b = min(2048, _round_up(B, 128))
    block_b = _round_up(block_b, 128)
    b_pad = _round_up(B, block_b)
    if b_pad != B:
        x = jnp.pad(x, ((0, b_pad - B), (0, 0)))
    grid = (b_pad // block_b,)

    b1_row = b1.reshape(1, H)
    w2_row = w2.reshape(1, H)
    b2_smem = b2.reshape(1, 1)

    kernel = functools.partial(_mlp_kernel, activation=activation)

    out_row = pl.pallas_call(
        kernel,
        out_shape=jax.ShapeDtypeStruct((1, b_pad), jnp.float32),
        grid=grid,
        in_specs=[
            # x streams in batch tiles.
            pl.BlockSpec((block_b, D), lambda i: (i, 0)),
            # Weights/biases: same block every step -> resident in VMEM.
            pl.BlockSpec((D, H), lambda i: (0, 0)),
            pl.BlockSpec((1, H), lambda i: (0, 0)),
            pl.BlockSpec((1, H), lambda i: (0, 0)),
            # b2: scalar in SMEM, read on the scalar slot.
            pl.BlockSpec(memory_space=pltpu.MemorySpace.SMEM),
        ],
        # Lane-dense output: one row, batch tiles along the lane axis.
        out_specs=pl.BlockSpec((1, block_b), lambda i: (0, i)),
        compiler_params=pltpu.CompilerParams(
            dimension_semantics=("parallel",),
        ),
    )(x, w1, b1_row, w2_row, b2_smem)

    # Free layout plumbing back to the PyTorch-style [B, 1] result.
    return out_row[0, :B].reshape(B, 1)


def net_forward_ref(x, w1, b1, w2, b2, *, activation="tanh"):
    z = x @ w1 + b1[None, :]
    a = _apply_activation(z, activation)
    return a @ w2 + b2[None, :]


if __name__ == "__main__":
    # Small shapes consistent with the module: dimension=16, number_of_neurons=32.
    # batch=200 with block_b=128 exercises a multi-step grid (2 tiles) plus the
    # padding/slicing path.  activation chosen statically (stands in for argv[2]).
    dimension = 16
    number_of_neurons = 32
    batch = 200
    activation = "tanh"

    key = jax.random.PRNGKey(0)
    kx, kw1, kb1, kw2 = jax.random.split(key, 4)

    x = jax.random.normal(kx, (batch, dimension), dtype=jnp.float32)
    # Deterministic parameter init (synthetic; Net.__init__ only defines shapes).
    w1 = jax.random.normal(kw1, (dimension, number_of_neurons), dtype=jnp.float32) * 0.1
    b1 = jax.random.normal(kb1, (number_of_neurons,), dtype=jnp.float32) * 0.1
    w2 = jax.random.normal(kw2, (number_of_neurons, 1), dtype=jnp.float32) * 0.1
    b2 = jnp.zeros((1,), dtype=jnp.float32)  # fc2.bias.data.fill_(0.0)

    out = net_forward(x, w1, b1, w2, b2, activation=activation, block_b=128)
    out = jax.block_until_ready(out)

    ref = net_forward_ref(x, w1, b1, w2, b2, activation=activation)
    assert out.shape == (batch, 1), out.shape
    assert jnp.allclose(out, ref, atol=1e-4, rtol=1e-4), (out, ref)

    print("KERNEL_OK")
</pallas_src>

<mosaic_0001>
module attributes {stable_mosaic.version = 11 : i64} {
  func.func @_mlp_kernel(%arg0: i32, %arg1: memref<128x16xf32, #tpu.memory_space<vmem>>, %arg2: memref<16x32xf32, #tpu.memory_space<vmem>>, %arg3: memref<1x32xf32, #tpu.memory_space<vmem>>, %arg4: memref<1x32xf32, #tpu.memory_space<vmem>>, %arg5: memref<1x1xf32, #tpu.memory_space<smem>>, %arg6: memref<1x128xf32, #tpu.memory_space<vmem>>) attributes {dimension_semantics = [#tpu.dimension_semantics<parallel>], iteration_bounds = array<i64: 2>, scalar_prefetch = 0 : i64, scratch_operands = 0 : i64, tpu.core_type = #tpu.core_type<tc>, window_params = [{transform_indices = @transform_0, window_bounds = array<i64: 128, 16>}, {pipeline_mode = #tpu.pipeline_mode<synchronous>, transform_indices = @transform_1, window_bounds = array<i64: 16, 32>}, {pipeline_mode = #tpu.pipeline_mode<synchronous>, transform_indices = @transform_2, window_bounds = array<i64: 1, 32>}, {pipeline_mode = #tpu.pipeline_mode<synchronous>, transform_indices = @transform_3, window_bounds = array<i64: 1, 32>}, {transform_indices = @transform_4, window_bounds = array<i64: 1, 1>}, {transform_indices = @transform_5, window_bounds = array<i64: 1, 128>}]} {
    %c0 = arith.constant 0 : index
    %c0_0 = arith.constant 0 : index
    %0 = vector.load %arg1[%c0, %c0_0] : memref<128x16xf32, #tpu.memory_space<vmem>>, vector<128x16xf32>
    %c0_1 = arith.constant 0 : index
    %c0_2 = arith.constant 0 : index
    %1 = vector.load %arg2[%c0_1, %c0_2] : memref<16x32xf32, #tpu.memory_space<vmem>>, vector<16x32xf32>
    %cst = arith.constant dense<0.000000e+00> : vector<128x32xf32>
    %2 = tpu.matmul %0, %1, %cst {dimension_numbers = #tpu.dot_dimension_numbers<[1], [0], [0], [1], [0, 0, 1, 1], [], []>} : vector<128x16xf32>, vector<16x32xf32>, vector<128x32xf32> -> vector<128x32xf32>
    %c0_3 = arith.constant 0 : index
    %c0_4 = arith.constant 0 : index
    %3 = vector.load %arg3[%c0_3, %c0_4] : memref<1x32xf32, #tpu.memory_space<vmem>>, vector<1x32xf32>
    %4 = vector.broadcast %3 : vector<1x32xf32> to vector<128x32xf32>
    %5 = arith.addf %2, %4 : vector<128x32xf32>
    %6 = math.tanh %5 : vector<128x32xf32>
    %c0_5 = arith.constant 0 : index
    %c0_6 = arith.constant 0 : index
    %7 = vector.load %arg4[%c0_5, %c0_6] : memref<1x32xf32, #tpu.memory_space<vmem>>, vector<1x32xf32>
    %8 = vector.broadcast %7 : vector<1x32xf32> to vector<128x32xf32>
    %9 = arith.mulf %6, %8 : vector<128x32xf32>
    %cst_7 = arith.constant dense<0.000000e+00> : vector<128xf32>
    %10 = vector.multi_reduction <add>, %9, %cst_7 [1] : vector<128x32xf32> to vector<128xf32>
    %c0_8 = arith.constant 0 : index
    %c0_9 = arith.constant 0 : index
    %11 = memref.load %arg5[%c0_8, %c0_9] : memref<1x1xf32, #tpu.memory_space<smem>>
    %12 = vector.broadcast %11 : f32 to vector<128xf32>
    %13 = arith.addf %10, %12 : vector<128xf32>
    %14 = vector.shape_cast %13 : vector<128xf32> to vector<1x128xf32>
    %c0_10 = arith.constant 0 : index
    %c0_11 = arith.constant 0 : index
    %15 = vector.load %arg6[%c0_10, %c0_11] : memref<1x128xf32, #tpu.memory_space<vmem>>, vector<1x128xf32>
    tpu.vector_store %arg6[%c0_10, %c0_11], %14 {strides = array<i32>} : memref<1x128xf32, #tpu.memory_space<vmem>>, vector<1x128xf32>,
    return
  }
  func.func @transform_0(%arg0: i32) -> (i32, i32) {
    %c0_i32 = arith.constant 0 : i32
    %c0_i32_0 = arith.constant 0 : i32
    return %arg0, %c0_i32 : i32, i32
  }
  func.func @transform_1(%arg0: i32) -> (i32, i32) {
    %c0_i32 = arith.constant 0 : i32
    %c0_i32_0 = arith.constant 0 : i32
    %c0_i32_1 = arith.constant 0 : i32
    return %c0_i32, %c0_i32_0 : i32, i32
  }
  func.func @transform_2(%arg0: i32) -> (i32, i32) {
    %c0_i32 = arith.constant 0 : i32
    %c0_i32_0 = arith.constant 0 : i32
    %c0_i32_1 = arith.constant 0 : i32
    return %c0_i32, %c0_i32_0 : i32, i32
  }
  func.func @transform_3(%arg0: i32) -> (i32, i32) {
    %c0_i32 = arith.constant 0 : i32
    %c0_i32_0 = arith.constant 0 : i32
    %c0_i32_1 = arith.constant 0 : i32
    return %c0_i32, %c0_i32_0 : i32, i32
  }
  func.func @transform_4(%arg0: i32) -> (i32, i32) {
    %c0_i32 = arith.constant 0 : i32
    %c0_i32_0 = arith.constant 0 : i32
    %c0_i32_1 = arith.constant 0 : i32
    return %c0_i32, %c0_i32_0 : i32, i32
  }
  func.func @transform_5(%arg0: i32) -> (i32, i32) {
    %c0_i32 = arith.constant 0 : i32
    %c0_i32_0 = arith.constant 0 : i32
    return %c0_i32, %arg0 : i32, i32
  }
}

</mosaic_0001>

<bundles_post_ra>
// kernel: tpu_custom_call.1
= control target key start
LH: loop header
LB: loop body
LE: loop exit
PB: predicated region body
PF: predicated region fallthrough
CT: control target
= control target key end

     0   :  { %s1018_s0 = inlined_call_operand.vmem [shape: f32[256,16], index: 0, kind: input, shape index: {}]   ;;  %s1019_s1 = inlined_call_operand.vmem [shape: f32[16,32], index: 1, kind: input, shape index: {}]   ;;  %s1020_s2 = inlined_call_operand.vmem [shape: f32[1,32], index: 2, kind: input, shape index: {}]   ;;  %s1021_s3 = inlined_call_operand.vmem [shape: f32[1,32], index: 3, kind: input, shape index: {}]   ;;  %s1022_s4 = inlined_call_operand.<no memory space> [shape: f32[1,1], index: 4, kind: input, shape index: {}]   ;;  %s1023_s5 = inlined_call_operand.hbm [shape: f32[1,256], index: 5, kind: output, shape index: {}]  }
   0x1   :  { %10 = sst [smem:[#allocation2]] %s1022_s4 }
   0x2   :  { %11 = vsyncpa [#allocation4], 0 }
   0x3   :  { %13 = vsyncpa [#allocation4 + $0x1], 0  ;;  %s813_s20 = smov 0   ;;  %s815_s21 = smov 0  }
   0x4   :  { %s817_s22 = smov 0   ;;  %s819_s23 = smov 0  }
   0x5 LB: > { %s834_s4 = sadd.s32 4294967295, %s778_s23   ;;  %s613_s24 = sadd.s32 4294967294, %s778_s23   ;;  %s778_s23 = sphi %s819_s23, %s1029_s23   ;;  %s774_s22 = sphi %s817_s22, %s1028_s22   ;;  %s770_s21 = sphi %s815_s21, %s1027_s21   ;;  %s766_s20 = sphi %s813_s20, %s1026_s20  }
   0x6   : > { %s838_s25 = sadd.s32 1, %s778_s23   ;;  %s136_s26 = sadd.s32 1, %s774_s22 }
   0x7   : > { %s133_s27 = ssub.s32 %s778_s23, %s838_s25  ;;  %p146_p0 = scmp.ne.s32.totalorder %s774_s22, %s770_s21 }
   0x8   : > { %p134_p1 = scmp.eq.s32.totalorder %s133_s27, 0  ;;  %p147_p2 = scmp.eq.s32.totalorder %s834_s4, 1 }
   0x9   : > { %p152_p3 = scmp.ne.s32.totalorder %s770_s21, %s766_s20  ;;  %p153_p4 = scmp.eq.s32.totalorder %s613_s24, 1 }
   0xa   : > { %s849_s28 = scalar_select %p134_p1, %s774_s22, %s136_s26  }
   0xb   : > { %p851_p5 = por %p147_p2, %p146_p0  ;;  %p855_p6 = por %p153_p4, %p152_p3 }
   0xc   : > { %p616_p7 = scmp.ge.s32.totalorder %s778_s23, 1  ;;  %p192_p8 = scmp.lt.s32.totalorder %s778_s23, 3 }
   0xe   : > { %p193_p9 = pnand %p616_p7, %p192_p8 }
   0xf   : > { %s617_s10 = sshll.u32 (!%p193_p9), %s834_s4, 4  ;;  %s446_s19 = sld [smem:[#allocation2]] (!%p193_p9) }
  0x10   : > { %196 = sbr.rel (%p193_p9) target bundleno = 338 (0x152), region = 40  ;;  %p220_p10 = scmp.lt.s32.totalorder (!%p193_p9), %s617_s10, 31 }
  0x11   : > { %s217_s24 = sand.u32 (!%p193_p9), 1, %s770_s21   ;;  %s554_s6 = scalar_lea.hbm (!%p193_p9), %s1023_s5, %s834_s4 }
  0x12   : > { %s218_s7 = scalar_lea.vmem (!%p193_p9), [#allocation3], %s217_s24  ;;  %s558_s9 = sshll.u32 (!%p193_p9), %s554_s6, 4  ;;  %s559_s9 = int_to_ptr.hbm [resolvable:$true] %s558_s9 }
  0x13   : > { %s556_s8 = sshll.u32 (!%p193_p9), %s218_s7, 4  ;;  %s546_s4 = scalar_lea.sflag (!%p193_p9), [#allocation4], %s217_s24  ;;  %s557_s8 = int_to_ptr.vmem [resolvable:$true] %s556_s8 }
  0x15   : > { %v242_v0 = vld [vmem:[%s1019_s1 + $0x8] sm:$0xff]  ;;  %v241_v1 = vld [vmem:[%s1019_s1] sm:$0xff]  ;;  %s1031_s10 = smov (!%p220_p10, %s617_s10), 31  ;;  %vm247_vm0 = vcmask 130048   ;;  %vm397_vm1 = vcmask 261120   ;;  %vm485_vm2 = vcmask 130112  }
  0x16   : > { %310 = vmatpush.msra.mxu0 %v242_v0  ;;  %637 = vmatpush.msra.mxu1 %v242_v0  ;;  %s618_s11 = sshll.u32 %s1031_s10, 3  ;;  %v890_v18 = vld [vmem:[%s1020_s2] ss:$0 sm:$0xff]  ;;  %vm489_vm3 = vcmask 195712   ;;  %vm493_vm4 = vcmask 261312   ;;  %vm497_vm5 = vcmask 326912  }
  0x17   : > { %638 = vmatpush.msra.mxu2 %v242_v0  ;;  %639 = vmatpush.msra.mxu3 %v242_v0  ;;  %s223_s14 = scalar_lea.vmem %s1018_s0, %s618_s11  ;;  %v897_v23 = vld [vmem:[%s1021_s3] ss:$0 sm:$0xff]  ;;  %vm501_vm6 = vcmask 392512   ;;  %vm505_vm7 = vcmask 458112   ;;  %vm509_vm8 = vcmask 523712   ;;  %vm513_vm9 = vcmask 589312  }
  0x18   : > { %311 = vmatpush.msra.mxu0 %v241_v1  ;;  %640 = vmatpush.msra.mxu1 %v241_v1  ;;  %v225_v2 = vld [vmem:[%s223_s14] sm:$0xff]  ;;  %v226_v6 = vld [vmem:[%s223_s14 + $0x8] sm:$0xff]  ;;  %v227_v10 = vld [vmem:[%s223_s14 + $0x10] sm:$0xff]  ;;  %vm517_vm10 = vcmask 654912   ;;  %vm521_vm11 = vcmask 720512   ;;  %vm525_vm12 = vcmask 786112  }
  0x19   : > { %641 = vmatpush.msra.mxu2 %v241_v1  ;;  %642 = vmatpush.msra.mxu3 %v241_v1  ;;  %v229_v3 = vld [vmem:[%s223_s14 + $0x20] sm:$0xff]  ;;  %v230_v7 = vld [vmem:[%s223_s14 + $0x28] sm:$0xff]  ;;  %v231_v11 = vld [vmem:[%s223_s14 + $0x30] sm:$0xff]  ;;  %vm529_vm13 = vcmask 851712   ;;  %vm533_vm14 = vcmask 917312   ;;  %vm537_vm15 = vcmask 982912  }
  0x1a   : > { %v233_v4 = vld [vmem:[%s223_s14 + $0x40] sm:$0xff]  ;;  %619 = vmatmul.msk.f32.vlgmr.msra.gmra.mxu0 %vm247_vm0, %v225_v2  ;;  %623 = vmatmul.msk.f32.vlgmr.msra.gmra.mxu1 %vm247_vm0, %v229_v3  ;;  %v234_v8 = vld [vmem:[%s223_s14 + $0x48] sm:$0xff]  ;;  %v235_v12 = vld [vmem:[%s223_s14 + $0x50] sm:$0xff]  ;;  %s730_s10 = sshra.s32 %s559_s9, 4  ;;  %s731_s10 = int_to_ptr.hbm [resolvable:$true] %s730_s10 }
  0x1b   : > { %627 = vmatmul.msk.f32.vlgmr.msra.gmra.mxu2 %vm247_vm0, %v233_v4  ;;  %v237_v5 = vld [vmem:[%s223_s14 + $0x60] sm:$0xff]  ;;  %v238_v9 = vld [vmem:[%s223_s14 + $0x68] sm:$0xff]  ;;  %v239_v13 = vld [vmem:[%s223_s14 + $0x70] sm:$0xff]  ;;  %s732_s11 = scalar_lea.hbm %s731_s10, 1  ;;  %p737_p0 = scmp.lt.s32.totalorder %s731_s10, %s1023_s5 }
  0x1c   : > { %631 = vmatmul.msk.f32.vlgmr.msra.gmra.mxu3 %vm247_vm0, %v237_v5  ;;  %v228_v14 = vld [vmem:[%s223_s14 + $0x18] sm:$0xff]  ;;  %p733_p11 = scmp.ne.s32.totalorder %s731_s10, %s732_s11 }
  0x1d   : > { %v232_v15 = vld [vmem:[%s223_s14 + $0x38] sm:$0xff] }
  0x1e   : > { %v236_v16 = vld [vmem:[%s223_s14 + $0x58] sm:$0xff]  ;;  %p734_p12 = pnand %p733_p11, %p851_p5 }
  0x1f   : > { %v240_v17 = vld [vmem:[%s223_s14 + $0x78] sm:$0xff]  ;;  %s736_s14 = scalar_lea.hbm %s1023_s5, 2 }
  0x20   : > { %p735_p13 = pneg %p734_p12  ;;  %p738_p1 = scmp.lt.s32.totalorder %s736_s14, %s732_s11 }
  0x22   : > { %620 = vmatmul.msk.f32.gmra.mxu0 %vm247_vm0, %v226_v6  ;;  %624 = vmatmul.msk.f32.gmra.mxu1 %vm247_vm0, %v230_v7  ;;  %p739_p2 = por %p738_p1, %p737_p0 }
  0x23   : > { %628 = vmatmul.msk.f32.gmra.mxu2 %vm247_vm0, %v234_v8 }
  0x24   : > { %632 = vmatmul.msk.f32.gmra.mxu3 %vm247_vm0, %v238_v9  ;;  %p740_p3 = pnand %p739_p2, %p735_p13 }
  0x2a   : > { %621 = vmatmul.msk.f32.gmra.mxu0 %vm247_vm0, %v227_v10  ;;  %625 = vmatmul.msk.f32.gmra.mxu1 %vm247_vm0, %v231_v11 }
  0x2b   : > { %629 = vmatmul.msk.f32.gmra.mxu2 %vm247_vm0, %v235_v12 }
  0x2c   : > { %633 = vmatmul.msk.f32.gmra.mxu3 %vm247_vm0, %v239_v13 }
  0x32   : > { %622 = vmatmul.msk.f32.gmra.mxu0 %vm247_vm0, %v228_v14  ;;  %626 = vmatmul.msk.f32.gmra.mxu1 %vm247_vm0, %v232_v15 }
  0x33   : > { %630 = vmatmul.msk.f32.gmra.mxu2 %vm247_vm0, %v236_v16 }
  0x34   : > { %634 = vmatmul.msk.f32.gmra.mxu3 %vm247_vm0, %v240_v17  ;;  %vm541_vm0 = vcmask 1048512  }
  0x97   : > { %v313_v19 = vpop.f32.mrf.mxu0  ;;  %v325_v20 = vpop.f32.mrf.mxu1 }
  0x98   : > { %v314_v21 = vadd.f32 %v890_v18, %v313_v19  ;;  %v326_v22 = vadd.f32 %v890_v18, %v325_v20 }
  0x9a   : > { %684 = vtanh.f32 %v314_v21 }
  0x9b   : > { %686 = vtanh.f32 %v326_v22 }
  0x9e   : > { %v337_v24 = vpop.f32.mrf.mxu2 }
  0x9f   : > { %v316_v25 = vpop.f32.mrf.mxu0  ;;  %v338_v26 = vadd.f32 %v890_v18, %v337_v24  ;;  %v328_v27 = vpop.f32.mrf.mxu1 }
  0xa0   : > { %v685_v28 = vpop.eup %684  ;;  %v317_v29 = vadd.f32 %v890_v18, %v316_v25  ;;  %v349_v30 = vpop.f32.mrf.mxu3  ;;  %v329_v33 = vadd.f32 %v890_v18, %v328_v27 }
  0xa1   : > { %v687_v31 = vpop.eup %686  ;;  %688 = vtanh.f32 %v338_v26  ;;  %v381_v32 = vmul.f32 %v685_v28, %v897_v23  ;;  %v350_v62 = vadd.f32 %v890_v18, %v349_v30 }
  0xa2   : > { %690 = vtanh.f32 %v317_v29  ;;  %v385_v34 = vmul.f32 %v687_v31, %v897_v23 }
  0xa3   : > { %v398_v35 = vsel %vm397_vm1, %v381_v32, 0.0  ;;  %692 = vtanh.f32 %v329_v33 }
  0xa4   : > { %v410_v36 = vsel %vm397_vm1, %v385_v34, 0.0  ;;  %399 = vadd.xlane.f32.xlu0 %v398_v35 }
  0xa5   : > { %411 = vadd.xlane.f32.xlu2 %v410_v36 }
  0xa6   : > { %v340_v37 = vpop.f32.mrf.mxu2 }
  0xa7   : > { %v689_v38 = vpop.eup %688  ;;  %v319_v39 = vpop.f32.mrf.mxu0  ;;  %v341_v40 = vadd.f32 %v890_v18, %v340_v37 }
  0xa8   : > { %v331_v41 = vpop.f32.mrf.mxu1  ;;  %v691_v42 = vpop.eup %690  ;;  %v320_v43 = vadd.f32 %v890_v18, %v319_v39  ;;  %v389_v44 = vmul.f32 %v689_v38, %v897_v23 }
  0xa9   : > { %v332_v45 = vadd.f32 %v890_v18, %v331_v41  ;;  %v352_v46 = vpop.f32.mrf.mxu3  ;;  %694 = vtanh.f32 %v341_v40  ;;  %v382_v47 = vmul.f32 %v691_v42, %v897_v23  ;;  %v693_v49 = vpop.eup %692 }
  0xaa   : > { %696 = vtanh.f32 %v320_v43  ;;  %v422_v48 = vsel %vm397_vm1, %v389_v44, 0.0  ;;  %v386_v52 = vmul.f32 %v693_v49, %v897_v23  ;;  %v353_v26 = vadd.f32 %v890_v18, %v352_v46 }
  0xab   : > { %v401_v50 = vsel %vm397_vm1, %v382_v47, 0.0  ;;  %698 = vtanh.f32 %v332_v45  ;;  %v480_v43 = vlaneseq  ;;  %v947_v46 = vstv %s446_s19 }
  0xac   : > { %402 = vadd.xlane.f32.xlu0 %v401_v50  ;;  %v413_v0 = vsel %vm397_vm1, %v386_v52, 0.0 }
  0xad   : > { %423 = vadd.xlane.f32.xlu2 %v422_v48  ;;  %v945_v45 = vand.u32 127, %v480_v43 }
  0xae   : > { %v343_v51 = vpop.f32.mrf.mxu2 }
  0xaf   : > { %v695_v53 = vpop.eup %694  ;;  %v344_v54 = vadd.f32 %v890_v18, %v343_v51  ;;  %v322_v55 = vpop.f32.mrf.mxu0  ;;  %v483_v48 = vadd.s32 4294967288, %v945_v45  ;;  %v487_v50 = vadd.s32 4294967280, %v945_v45 }
  0xb0   : > { %v697_v56 = vpop.eup %696  ;;  %v390_v57 = vmul.f32 %v695_v53, %v897_v23  ;;  %v323_v58 = vadd.f32 %v890_v18, %v322_v55  ;;  %v334_v2 = vpop.f32.mrf.mxu1  ;;  %v495_v55 = vadd.s32 4294967264, %v945_v45 }
  0xb1   : > { %v355_v59 = vpop.f32.mrf.mxu3  ;;  %700 = vtanh.f32 %v344_v54  ;;  %v383_v60 = vmul.f32 %v697_v56, %v897_v23  ;;  %v699_v61 = vpop.eup %698  ;;  %v335_v5 = vadd.f32 %v890_v18, %v334_v2  ;;  %v491_v54 = vadd.s32 4294967272, %v945_v45 }
  0xb2   : > { %v425_v63 = vsel %vm397_vm1, %v390_v57, 0.0  ;;  %702 = vtanh.f32 %v323_v58  ;;  %v387_v3 = vmul.f32 %v699_v61, %v897_v23  ;;  %v356_v8 = vadd.f32 %v890_v18, %v355_v59 }
  0xb3   : > { %v404_v1 = vsel %vm397_vm1, %v383_v60, 0.0  ;;  %704 = vtanh.f32 %v350_v62  ;;  %v499_v61 = vadd.s32 4294967256, %v945_v45 }
  0xb4   : > { %405 = vadd.xlane.f32.xlu1 %v404_v1  ;;  %426 = vadd.xlane.f32.xlu0 %v425_v63  ;;  %v416_v11 = vsel %vm397_vm1, %v387_v3, 0.0 }
  0xb5   : > { %414 = vadd.xlane.f32.xlu2 %v413_v0 }
  0xb6   : > { %v346_v4 = vpop.f32.mrf.mxu2 }
  0xb7   : > { %v701_v6 = vpop.eup %700  ;;  %v347_v7 = vadd.f32 %v890_v18, %v346_v4 }
  0xb8   : > { %v391_v9 = vmul.f32 %v701_v6, %v897_v23  ;;  %v703_v13 = vpop.eup %702  ;;  %v503_v6 = vadd.s32 4294967248, %v945_v45 }
  0xb9   : > { %v358_v10 = vpop.f32.mrf.mxu3  ;;  %706 = vtanh.f32 %v347_v7  ;;  %v705_v15 = vpop.eup %704  ;;  %v384_v16 = vmul.f32 %v703_v13, %v897_v23  ;;  %v515_v13 = vadd.s32 4294967224, %v945_v45 }
  0xba   : > { %v359_v12 = vadd.f32 %v890_v18, %v358_v10  ;;  %v428_v14 = vsel %vm397_vm1, %v391_v9, 0.0  ;;  %708 = vtanh.f32 %v335_v5  ;;  %v393_v19 = vmul.f32 %v705_v15, %v897_v23 }
  0xbb   : > { %710 = vtanh.f32 %v356_v8  ;;  %v407_v24 = vsel %vm397_vm1, %v384_v16, 0.0  ;;  %v507_v10 = vadd.s32 4294967240, %v945_v45 }
  0xbc   : > { %429 = vadd.xlane.f32.xlu1 %v428_v14  ;;  %417 = vadd.xlane.f32.xlu0 %v416_v11  ;;  %712 = vtanh.f32 %v359_v12  ;;  %v434_v28 = vsel %vm397_vm1, %v393_v19, 0.0  ;;  %v511_v11 = vadd.s32 4294967232, %v945_v45  ;;  %v519_v19 = vadd.s32 4294967216, %v945_v45 }
  0xbd   : > { %714 = vtanh.f32 %v353_v26 }
  0xbf   : > { %v707_v17 = vpop.eup %706 }
  0xc0   : > { %v709_v20 = vpop.eup %708  ;;  %v392_v21 = vmul.f32 %v707_v17, %v897_v23 }
  0xc1   : > { %v711_v22 = vpop.eup %710  ;;  %v388_v30 = vmul.f32 %v709_v20, %v897_v23 }
  0xc2   : > { %v713_v25 = vpop.eup %712  ;;  %v431_v27 = vsel %vm397_vm1, %v392_v21, 0.0  ;;  %v395_v29 = vmul.f32 %v711_v22, %v897_v23  ;;  %v523_v22 = vadd.s32 4294967208, %v945_v45 }
  0xc3   : > { %432 = vadd.xlane.f32.xlu2 %v431_v27  ;;  %v396_v31 = vmul.f32 %v713_v25, %v897_v23  ;;  %v419_v33 = vsel %vm397_vm1, %v388_v30, 0.0  ;;  %v715_v34 = vpop.eup %714  ;;  %v527_v27 = vadd.s32 4294967200, %v945_v45 }
  0xc4   : > { %408 = vadd.xlane.f32.xlu1 %v407_v24  ;;  %435 = vadd.xlane.f32.xlu0 %v434_v28  ;;  %v440_v32 = vsel %vm397_vm1, %v395_v29, 0.0  ;;  %v394_v35 = vmul.f32 %v715_v34, %v897_v23 }
  0xc5   : > { %v443_v18 = vsel %vm397_vm1, %v396_v31, 0.0 }
  0xc6   : > { %v437_v36 = vsel %vm397_vm1, %v394_v35, 0.0  ;;  %v531_v35 = vadd.s32 4294967192, %v945_v45 }
  0xcb   : > { %441 = vadd.xlane.f32.xlu2 %v440_v32 }
  0xcc   : > { %420 = vadd.xlane.f32.xlu1 %v419_v33  ;;  %444 = vadd.xlane.f32.xlu0 %v443_v18 }
  0xd4   : > { %438 = vadd.xlane.f32.xlu1 %v437_v36 }
 0x117   : > { %v400_v37 = vpop.xlane.xlu0 %399 }
 0x118   : > { %v412_v39 = vpop.xlane.xlu2 %411  ;;  %v448_v52 = vadd.f32 %v947_v46, %v400_v37 }
 0x119   : > { %v452_v56 = vadd.f32 %v947_v46, %v412_v39 }
 0x11a   : > { %v482_v59 = vperm.slane %v448_v52, %v945_v45 }
 0x11b   : > { %v496_v2 = vperm.slane %v452_v56, %v495_v55 }
 0x11f   : > { %v403_v38 = vpop.xlane.xlu0 %402 }
 0x120   : > { %v424_v42 = vpop.xlane.xlu2 %423  ;;  %v449_v23 = vadd.f32 %v947_v46, %v403_v38  ;;  %v539_v38 = vadd.s32 4294967176, %v945_v45 }
 0x121   : > { %v456_v12 = vadd.f32 %v947_v46, %v424_v42 }
 0x122   : > { %v484_v53 = vperm.slane %v449_v23, %v483_v48 }
 0x123   : > { %v512_v26 = vperm.slane %v456_v12, %v511_v11 }
 0x124   : > { %v486_v62 = vsel %vm485_vm2, %v484_v53, %v482_v59 }
 0x127   : > { %v406_v40 = vpop.xlane.xlu1 %405  ;;  %v427_v41 = vpop.xlane.xlu0 %426 }
 0x128   : > { %v415_v49 = vpop.xlane.xlu2 %414  ;;  %v450_v51 = vadd.f32 %v947_v46, %v406_v40  ;;  %v457_v15 = vadd.f32 %v947_v46, %v427_v41  ;;  %v535_v40 = vadd.s32 4294967184, %v945_v45 }
 0x129   : > { %v453_v63 = vadd.f32 %v947_v46, %v415_v49 }
 0x12a   : > { %v488_v57 = vperm.slane %v450_v51, %v487_v50  ;;  %v516_v30 = vperm.slane %v457_v15, %v515_v13 }
 0x12b   : > { %v500_v9 = vperm.slane %v453_v63, %v499_v61 }
 0x12c   : > { %v490_v3 = vsel %vm489_vm3, %v488_v57, %v486_v62 }
 0x12f   : > { %v430_v44 = vpop.xlane.xlu1 %429  ;;  %v418_v47 = vpop.xlane.xlu0 %417 }
 0x130   : > { %v454_v7 = vadd.f32 %v947_v46, %v418_v47  ;;  %v458_v20 = vadd.f32 %v947_v46, %v430_v44 }
 0x132   : > { %v504_v21 = vperm.slane %v454_v7, %v503_v6  ;;  %v520_v33 = vperm.slane %v458_v20, %v519_v19 }
 0x136   : > { %v433_v1 = vpop.xlane.xlu2 %432 }
 0x137   : > { %v409_v58 = vpop.xlane.xlu1 %408  ;;  %v436_v4 = vpop.xlane.xlu0 %435  ;;  %v459_v24 = vadd.f32 %v947_v46, %v433_v1 }
 0x138   : > { %v451_v60 = vadd.f32 %v947_v46, %v409_v58  ;;  %v460_v18 = vadd.f32 %v947_v46, %v436_v4 }
 0x139   : > { %v524_v36 = vperm.slane %v459_v24, %v523_v22 }
 0x13a   : > { %v492_v0 = vperm.slane %v451_v60, %v491_v54  ;;  %v528_v48 = vperm.slane %v460_v18, %v527_v27 }
 0x13c   : > { %v494_v5 = vsel %vm493_vm4, %v492_v0, %v490_v3 }
 0x13d   : > { %v498_v8 = vsel %vm497_vm5, %v496_v2, %v494_v5 }
 0x13e   : > { %v502_v17 = vsel %vm501_vm6, %v500_v9, %v498_v8  ;;  %v442_v32 = vpop.xlane.xlu2 %441 }
 0x13f   : > { %v421_v14 = vpop.xlane.xlu1 %420  ;;  %v506_v28 = vsel %vm505_vm7, %v504_v21, %v502_v17  ;;  %v445_v29 = vpop.xlane.xlu0 %444  ;;  %v462_v41 = vadd.f32 %v947_v46, %v442_v32 }
 0x140   : > { %v455_v16 = vadd.f32 %v947_v46, %v421_v14  ;;  %v463_v39 = vadd.f32 %v947_v46, %v445_v29 }
 0x141   : > { %v536_v45 = vperm.slane %v462_v41, %v535_v40 }
 0x142   : > { %v508_v25 = vperm.slane %v455_v16, %v507_v10  ;;  %v540_v49 = vperm.slane %v463_v39, %v539_v38 }
 0x144   : > { %v510_v31 = vsel %vm509_vm8, %v508_v25, %v506_v28 }
 0x145   : > { %v514_v34 = vsel %vm513_vm9, %v512_v26, %v510_v31 }
 0x146   : > { %v518_v37 = vsel %vm517_vm10, %v516_v30, %v514_v34 }
 0x147   : > { %v439_v42 = vpop.xlane.xlu1 %438  ;;  %v522_v43 = vsel %vm521_vm11, %v520_v33, %v518_v37 }
 0x148   : > { %v461_v44 = vadd.f32 %v947_v46, %v439_v42  ;;  %v526_v47 = vsel %vm525_vm12, %v524_v36, %v522_v43 }
 0x149   : > { %v530_v50 = vsel %vm529_vm13, %v528_v48, %v526_v47 }
 0x14a   : > { %v532_v23 = vperm.slane %v461_v44, %v531_v35 }
 0x14c   : > { %v534_v51 = vsel %vm533_vm14, %v532_v23, %v530_v50 }
 0x14d   : > { %v538_v52 = vsel %vm537_vm15, %v536_v45, %v534_v51 }
 0x14e   : > { %v542_v46 = vsel %vm541_vm0, %v540_v49, %v538_v52 }
 0x14f   : > { %544 = vst [vmem:[%s218_s7] sm:$0x1] %v542_v46 }
 0x150   : > { %743 = shalt.err (!%p740_p3)
}
 0x151   : > { %643 = dma.vmem_to_hbm [thread:$0]  (%p851_p5), %s557_s8, 16, %s559_s9, %s546_s4  }
 0x152 PF: > { %p649_p4 = scmp.ge.s32.totalorder %s778_s23, 2  ;;  %s570_s17 = sand.u32 1, %s766_s20  }
 0x153   : > { %s571_s18 = scalar_lea.sflag [#allocation4], %s570_s17 }
 0x154   : > { %p646_p7 = pnand %p649_p4, %p855_p6 }
 0x156   : > { %p647_p8 = pneg %p646_p7 }
 0x158   : > { %761 = dma.done.wait (%p647_p8), %s571_s18, 16  }
 0x159   : > { %763 = vsyncadd (%p647_p8), %s571_s18, 4294967280  ;;  %p16_p9 = scmp.ge.s32.totalorder %s838_s25, 4   ;;  %s1026_s20 = smov %s770_s21 }
 0x15a   : > { %s1027_s21 = smov %s774_s22  ;;  %s1028_s22 = smov %s849_s28 }
 0x15b   : > { %s1029_s23 = smov %s838_s25  ;;  %18 = sbr.rel (!%p16_p9) target bundleno = 5 (0x5), region = 75 }
 0x160   :  { %576 = vsyncpa [#allocation4], 1 }
 0x161   :  { %578 = vsyncpa [#allocation4 + $0x1], 1 }

</bundles_post_ra>
